<compile_context>
chip_gen: v6e
topology: v6e:2x2x1
jax: 0.10.0
libtpu: 0.0.40
codegen_flags: <defaults>
</compile_context>

<pallas_src>
import jax
import jax.numpy as jnp
from jax.experimental import pallas as pl
from jax.experimental.pallas import tpu as pltpu


def _make_positional_table(num_hiddens: int, max_len: int = 1000,
                           dtype=jnp.float32) -> jnp.ndarray:
    """Deterministic table construction (mirrors PositionalEncoding.__init__).

    Pass dtype=activation dtype to cache the table pre-cast at init time and
    skip even the in-kernel cast.
    """
    assert num_hiddens % 2 == 0, "num_hiddens must be even (same limitation as the reference)"
    pos = jnp.arange(max_len, dtype=jnp.float32).reshape(-1, 1)
    div = jnp.power(
        10000.0, jnp.arange(0, num_hiddens, 2, dtype=jnp.float32) / num_hiddens
    )
    X = pos / div  # (max_len, num_hiddens // 2)
    P = jnp.zeros((1, max_len, num_hiddens), dtype=jnp.float32)
    P = P.at[:, :, 0::2].set(jnp.sin(X))
    P = P.at[:, :, 1::2].set(jnp.cos(X))
    return P.astype(dtype)


def _pe_add_kernel(x_ref, p_ref, o_ref):
    # x_ref/o_ref: (TB, TR, C) tile; p_ref: (TR, C) shared positional tile.
    # Cast P to the activation dtype in-kernel (free on the VPU for this
    # HBM-bound kernel) and broadcast over the batch tile.  Note: for
    # half-precision inputs this adds/returns in x.dtype, whereas PyTorch
    # would promote bf16 + f32 -> f32; acceptable and documented.
    o_ref[...] = x_ref[...] + p_ref[...].astype(x_ref.dtype)[None, :, :]


def _pe_add(x3: jnp.ndarray, p2: jnp.ndarray, *, donate_x: bool = False) -> jnp.ndarray:
    """Elementwise x3 + p2[None], tiled along (row, batch) axes."""
    B, R, C = x3.shape
    x_isz = jnp.dtype(x3.dtype).itemsize
    p_isz = jnp.dtype(p2.dtype).itemsize

    # Double-buffered per-step footprint target. 24 MiB keeps us well inside
    # the 32 MiB vmem_limit below and under v7x's 64 MiB physical VMEM while
    # being large enough to sit near the HBM roofline on all three chips.
    budget = 24 * 1024 * 1024

    def step_bytes(tb: int, rows: int) -> int:
        # 2x for double buffering: x block + out block (x dtype) + P block (f32).
        return 2 * rows * C * (2 * tb * x_isz + p_isz)

    # Pick the batch tile first: keep the full batch per step unless that
    # would crush the row tile below ~512 rows (big contiguous DMA segments).
    target_rows = min(R, 512)
    TB = B
    if step_bytes(B, target_rows) > budget:
        TB = max(1, int((budget // (2 * target_rows * C) - p_isz) // (2 * x_isz)))
        TB = min(TB, B)

    # Row tile from the remaining budget (sublane-aligned), explicit guard
    # against exceeding the budget when a single 8-row tile is already huge.
    tile_rows = max(1, int(budget // (2 * C * (2 * TB * x_isz + p_isz))))
    if tile_rows >= R:
        tile_rows = R  # whole row axis in one block
    else:
        tile_rows = max(8, (tile_rows // 8) * 8)

    grid_r = pl.cdiv(R, tile_rows)
    grid_b = pl.cdiv(B, TB)

    # v7x megacore: a single grid point runs on one TensorCore only.  If the
    # whole problem fits one tile but the row axis is splittable, force >=2
    # row tiles so both cores get work ("parallel" axes below).
    if grid_r * grid_b == 1 and R >= 16:
        tile_rows = max(8, ((R // 2) // 8) * 8)
        grid_r = pl.cdiv(R, tile_rows)

    extra = {}
    if donate_x:
        extra["input_output_aliases"] = {0: 0}

    return pl.pallas_call(
        _pe_add_kernel,
        out_shape=jax.ShapeDtypeStruct((B, R, C), x3.dtype),
        grid_spec=pltpu.PrefetchScalarGridSpec(
            num_scalar_prefetch=0,
            # Batch axis innermost: consecutive steps keep the same P block
            # index, so Pallas elides the P re-DMA across batch tiles.
            grid=(grid_r, grid_b),
            in_specs=[
                pl.BlockSpec((TB, tile_rows, C), lambda r, b: (b, r, 0)),  # x tile
                pl.BlockSpec((tile_rows, C), lambda r, b: (r, 0)),          # P tile (b-invariant)
            ],
            out_specs=pl.BlockSpec((TB, tile_rows, C), lambda r, b: (b, r, 0)),
        ),
        compiler_params=pltpu.CompilerParams(
            dimension_semantics=("parallel", "parallel"),
            vmem_limit_bytes=32 * 1024 * 1024,
        ),
        **extra,
    )(x3, p2)


def positional_encoding_forward(x: jnp.ndarray, P: jnp.ndarray,
                                *, donate_x: bool = False) -> jnp.ndarray:
    """Forward pass: X + P[:, :L, :]; dropout in eval mode is the identity."""
    B, L, H = x.shape
    if L > P.shape[1]:
        raise ValueError(f"sequence length {L} exceeds max_len {P.shape[1]}")

    # Slice only (no dtype cast here): the cast happens inside the kernel, so
    # P is never rewritten to HBM in a separate pass.
    p = P[0, :L, :]  # (L, H), table dtype (f32 unless pre-cast at init)

    LH = L * H
    if LH % 128 == 0:
        # Lane-dense path: view each batch row as (R, 128) -> full-width vst.
        C = 128
        R = LH // C
        x3 = x.reshape(B, R, C)
        p2 = p.reshape(R, C)
    else:
        # TODO(synk): when L*H is not a multiple of 128 the output last dim is
        # H (< 128 possible) which lowers to masked partial stores; padding H
        # to a multiple of 128 at table-construction time would avoid it but
        # changes the caller-visible layout, so we keep the correct fallback.
        C = H
        R = L
        x3 = x
        p2 = p

    out3 = _pe_add(x3, p2, donate_x=donate_x)

    # TODO(synk): nn.Dropout in training mode uses PyTorch's RNG stream and cannot be
    # reproduced bit-exactly; eval-mode dropout is the identity, which is what we apply.
    return out3.reshape(B, L, H)


if __name__ == "__main__":
    batch, seq_len, num_hiddens = 2, 8, 32
    max_len = 1000

    key = jax.random.PRNGKey(0)
    x = jax.random.normal(key, (batch, seq_len, num_hiddens), dtype=jnp.float32)

    P = _make_positional_table(num_hiddens, max_len)

    out = positional_encoding_forward(x, P)
    out = jax.block_until_ready(out)

    # Sanity check against pure-JAX reference of the same forward semantics.
    ref = x + P[:, :seq_len, :]
    assert out.shape == (batch, seq_len, num_hiddens)
    assert jnp.allclose(out, ref, atol=1e-6), "mismatch vs reference"

    print("KERNEL_OK")
</pallas_src>

<mosaic_0001>
module attributes {stable_mosaic.version = 11 : i64} {
  func.func @_pe_add_kernel(%arg0: i32, %arg1: i32, %arg2: memref<2x2x128xf32, #tpu.memory_space<vmem>>, %arg3: memref<2x128xf32, #tpu.memory_space<vmem>>, %arg4: memref<2x2x128xf32, #tpu.memory_space<vmem>>) attributes {dimension_semantics = [#tpu.dimension_semantics<parallel>, #tpu.dimension_semantics<parallel>], iteration_bounds = array<i64: 1, 1>, scalar_prefetch = 0 : i64, scratch_operands = 0 : i64, tpu.core_type = #tpu.core_type<tc>, window_params = [{transform_indices = @transform_0, window_bounds = array<i64: 2, 2, 128>}, {transform_indices = @transform_1, window_bounds = array<i64: 2, 128>}, {transform_indices = @transform_2, window_bounds = array<i64: 2, 2, 128>}]} {
    %c0 = arith.constant 0 : index
    %c0_0 = arith.constant 0 : index
    %c0_1 = arith.constant 0 : index
    %0 = vector.load %arg2[%c0, %c0_0, %c0_1] : memref<2x2x128xf32, #tpu.memory_space<vmem>>, vector<2x2x128xf32>
    %c0_2 = arith.constant 0 : index
    %c0_3 = arith.constant 0 : index
    %1 = vector.load %arg3[%c0_2, %c0_3] : memref<2x128xf32, #tpu.memory_space<vmem>>, vector<2x128xf32>
    %2 = vector.shape_cast %1 : vector<2x128xf32> to vector<1x2x128xf32>
    %3 = vector.broadcast %2 : vector<1x2x128xf32> to vector<2x2x128xf32>
    %4 = arith.addf %0, %3 : vector<2x2x128xf32>
    %c0_4 = arith.constant 0 : index
    %c0_5 = arith.constant 0 : index
    %c0_6 = arith.constant 0 : index
    %5 = vector.load %arg4[%c0_4, %c0_5, %c0_6] : memref<2x2x128xf32, #tpu.memory_space<vmem>>, vector<2x2x128xf32>
    tpu.vector_store %arg4[%c0_4, %c0_5, %c0_6], %4 {strides = array<i32>} : memref<2x2x128xf32, #tpu.memory_space<vmem>>, vector<2x2x128xf32>,
    return
  }
  func.func @transform_0(%arg0: i32, %arg1: i32) -> (i32, i32, i32) {
    %c0_i32 = arith.constant 0 : i32
    %c0_i32_0 = arith.constant 0 : i32
    return %arg1, %arg0, %c0_i32 : i32, i32, i32
  }
  func.func @transform_1(%arg0: i32, %arg1: i32) -> (i32, i32) {
    %c0_i32 = arith.constant 0 : i32
    %c0_i32_0 = arith.constant 0 : i32
    return %arg0, %c0_i32 : i32, i32
  }
  func.func @transform_2(%arg0: i32, %arg1: i32) -> (i32, i32, i32) {
    %c0_i32 = arith.constant 0 : i32
    %c0_i32_0 = arith.constant 0 : i32
    return %arg1, %arg0, %c0_i32 : i32, i32, i32
  }
}

</mosaic_0001>

<bundles_post_ra>
// kernel: tpu_custom_call.1
= control target key start
LH: loop header
LB: loop body
LE: loop exit
PB: predicated region body
PF: predicated region fallthrough
CT: control target
= control target key end

     0   :  { %7 = vsyncpa [#allocation3], 0  ;;  %s169_s0 = inlined_call_operand.hbm [shape: f32[2,2,128], index: 0, kind: input, shape index: {}]   ;;  %s170_s1 = inlined_call_operand.hbm [shape: f32[2,128], index: 1, kind: input, shape index: {}]   ;;  %s171_s2 = inlined_call_operand.hbm [shape: f32[2,2,128], index: 2, kind: output, shape index: {}]  }
   0x1   :  { %8 = vsyncpa [#allocation6], 0 }
   0x2   :  { %9 = vsyncpa [#allocation4], 0  ;;  %s134_s9 = smov [#allocation2]  }
   0x3   :  { %s15_s10 = sshll.u32 %s134_s9, 4  ;;  %s16_s10 = int_to_ptr.vmem [resolvable:$true] %s15_s10 }
   0x4   :  { %s76_s11 = scalar_lea.vmem %s16_s10, 64  ;;  %p81_p1 = scmp.lt.s32.totalorder %s16_s10, %s16_s10 }
   0x5   :  { %p77_p0 = scmp.ne.s32.totalorder %s16_s10, %s76_s11  ;;  %p82_p2 = scmp.lt.s32.totalorder %s76_s11, %s76_s11 }
   0x7   :  { %p83_p3 = por %p82_p2, %p81_p1 }
   0x9   :  { %p84_p4 = pnand %p83_p3, %p77_p0 }
   0xb   :  { %87 = shalt.err (!%p84_p4)
}
   0xc   :  { %s135_s12 = smov 32   ;;  %s136_s13 = smov 2  }
   0xd   :  { %21 = dma.hbm_to_vmem [thread:$0]  %s169_s0, 64, %s16_s10, [#allocation3], %s135_s12, %s135_s12, %s136_s13  }
   0xe   :  { %s137_s16 = smov [#allocation5]  }
   0xf   :  { %s28_s17 = sshll.u32 %s137_s16, 4  ;;  %s29_s17 = int_to_ptr.vmem [resolvable:$true] %s28_s17 }
  0x10   :  { %s96_s18 = scalar_lea.vmem %s29_s17, 32  ;;  %p101_p6 = scmp.lt.s32.totalorder %s29_s17, %s29_s17 }
  0x11   :  { %p97_p5 = scmp.ne.s32.totalorder %s29_s17, %s96_s18  ;;  %p102_p7 = scmp.lt.s32.totalorder %s96_s18, %s96_s18 }
  0x13   :  { %p103_p8 = por %p102_p7, %p101_p6 }
  0x15   :  { %p104_p9 = pnand %p103_p8, %p97_p5 }
  0x17   :  { %107 = shalt.err (!%p104_p9)
}
  0x18   :  { %31 = dma.hbm_to_vmem [thread:$0]  %s170_s1, 32, %s29_s17, [#allocation6]  }
  0x19   :  { %128 = dma.done.wait [#allocation3], 64  }
  0x1a   :  { %129 = vsyncadd [#allocation3], 4294967232 }
  0x1b   :  { %130 = dma.done.wait [#allocation6], 32  }
  0x1c   :  { %131 = vsyncadd [#allocation6], 4294967264  ;;  %s138_s21 = smov [#allocation7]   ;;  %v38_v0 = vld [vmem:[#allocation2] sm:$0x3] }
  0x1d   :  { %s50_s0 = sshll.u32 %s138_s21, 4  ;;  %v40_v1 = vld [vmem:[#allocation5] sm:$0x3]  ;;  %v39_v2 = vld [vmem:[#allocation2 + $0x2] sm:$0x3]  ;;  %s51_s0 = int_to_ptr.vmem [resolvable:$true] %s50_s0 }
  0x1e   :  { %v41_v3 = vadd.f32 %v40_v1, %v38_v0  ;;  %v42_v4 = vadd.f32 %v40_v1, %v39_v2  ;;  %s108_s22 = scalar_lea.vmem %s51_s0, 64  ;;  %p113_p11 = scmp.lt.s32.totalorder %s51_s0, %s51_s0 }
  0x1f   :  { %p109_p10 = scmp.ne.s32.totalorder %s51_s0, %s108_s22  ;;  %p114_p12 = scmp.lt.s32.totalorder %s108_s22, %s108_s22 }
  0x20   :  { %43 = vst [vmem:[#allocation7] sm:$0x3] %v41_v3  ;;  %44 = vst [vmem:[#allocation7 + $0x2] sm:$0x3] %v42_v4 }
  0x21   :  { %p115_p13 = por %p114_p12, %p113_p11 }
  0x23   :  { %p116_p0 = pnand %p115_p13, %p109_p10 }
  0x25   :  { %119 = shalt.err (!%p116_p0)
}
  0x26   :  { %56 = dma.vmem_to_hbm [thread:$0]  %s51_s0, 64, %s171_s2, [#allocation4], %s135_s12, %s135_s12, %s136_s13  }
  0x27   :  { %132 = dma.done.wait [#allocation4], 64  }
  0x28   :  { %133 = vsyncadd [#allocation4], 4294967232 }
  0x29   :  { %60 = vsyncpa [#allocation3], 1 }
  0x2a   :  { %61 = vsyncpa [#allocation6], 1 }
  0x2b   :  { %62 = vsyncpa [#allocation4], 1 }

</bundles_post_ra>
